<compile_context>
chip_gen: v6e
topology: v6e:2x2x1
jax: 0.10.0
libtpu: 0.0.40
codegen_flags: <defaults>
</compile_context>

<pallas_src>
import jax
import jax.numpy as jnp
from jax.experimental import pallas as pl
from jax.experimental.pallas import tpu as pltpu


def _coil_split_kernel(im_ref, sens_ref, o_ref):
    # im_ref:   (TBC, 1,     THW)
    # sens_ref: (TBC, Ncoil, THW)
    # o_ref:    (TBC, Ncoil, THW)
    # Implicit broadcast of im over the coil (sublane) axis; pure VPU work.
    o_ref[...] = sens_ref[...] * im_ref[...]


def _round_up(x, m):
    return (x + m - 1) // m * m


def _step_bytes(tbc, thw, ncoil, itemsize):
    # Double-buffered working set per grid step:
    #   sens block + out block (ncoil*thw each) + im block (1*thw), x2 buffers.
    return 2 * itemsize * tbc * thw * (2 * ncoil + 1)


def _vmem_capacity_bytes():
    try:
        return int(pltpu.get_tpu_info().vmem_capacity_bytes)
    except Exception:
        return 64 << 20  # conservative fallback (v7x per-TensorCore VMEM)


def _choose_tiles(bc, ncoil, hw, itemsize, budget, target_steps=8):
    """Pick (TBC, THW) block extents.

    * THW is a multiple of 128 dividing HW when HW % 128 == 0, otherwise HW
      itself (full extent; legal, only a masked tail store per row).
    * TBC is any divisor of BC (leading block dim -> no (8,128) constraint).
    * The double-buffered working set stays under `budget`.
    * Prefer >= `target_steps` total grid steps (v7x megacore sharding), then
      the largest block (fewest steps beyond the target).
    """
    if hw % 128 == 0:
        hw_divs = [d for d in range(128, hw + 1, 128) if hw % d == 0]
    else:
        hw_divs = [hw]
    bc_divs = [d for d in range(1, bc + 1) if bc % d == 0]

    candidates = []
    for thw in hw_divs:
        for tbc in bc_divs:
            steps = (bc // tbc) * (hw // thw)
            blk = _step_bytes(tbc, thw, ncoil, itemsize)
            candidates.append((tbc, thw, steps, blk))

    feasible = [c for c in candidates if c[3] <= budget]
    if not feasible:
        # Even the smallest block busts the budget; return it and let the
        # caller size vmem_limit_bytes (or fall back to lane padding).
        tbc, thw, _, _ = min(candidates, key=lambda c: c[3])
        return tbc, thw

    goal = min(target_steps, max(c[2] for c in feasible))
    good = [c for c in feasible if c[2] >= goal]
    tbc, thw, _, _ = max(good, key=lambda c: c[3])
    return tbc, thw


def coil_split(im, sens, *, target_steps=8):
    """im: [B, C, H, W], sens: [B, C, Ncoil, H, W] -> [B, C, Ncoil, H, W]."""
    B, C, H, W = im.shape
    Bs, Cs, Ncoil, Hs, Ws = sens.shape
    assert (B, C, H, W) == (Bs, Cs, Hs, Ws), "im/sens shape mismatch"
    assert im.dtype == sens.dtype, "im/sens dtype mismatch"
    if jnp.issubdtype(sens.dtype, jnp.complexfloating):
        # TODO(synk): split complex multiply into real/imag planes.
        raise NotImplementedError("coil_split: complex dtypes not supported yet")

    BC = B * C
    HW = H * W
    itemsize = jnp.dtype(sens.dtype).itemsize

    vmem_cap = _vmem_capacity_bytes()
    budget = vmem_cap // 2            # double-buffered working-set budget
    hard_cap = int(vmem_cap * 0.85)   # headroom for compiler-internal scratch

    hw_eff = HW
    padded = False
    tbc, thw = _choose_tiles(BC, Ncoil, HW, itemsize, budget, target_steps)
    if _step_bytes(tbc, thw, Ncoil, itemsize) > hard_cap and HW % 128 != 0:
        # Last resort: a single full-HW row block cannot fit in VMEM and the
        # lane dim is not 128-aligned -> pad to unlock HW tiling (one extra
        # pad/slice HBM pass, but no compile-time VMEM OOM).
        hw_eff = _round_up(HW, 128)
        padded = True
        tbc, thw = _choose_tiles(BC, Ncoil, hw_eff, itemsize, budget, target_steps)

    im_r = im.reshape(BC, 1, HW)
    sens_r = sens.reshape(BC, Ncoil, HW)
    if padded:
        pad = hw_eff - HW
        im_r = jnp.pad(im_r, ((0, 0), (0, 0), (0, pad)))
        sens_r = jnp.pad(sens_r, ((0, 0), (0, 0), (0, pad)))

    grid = (BC // tbc, hw_eff // thw)

    blk_bytes = _step_bytes(tbc, thw, Ncoil, itemsize)
    vmem_limit = min(hard_cap, max(16 << 20, int(blk_bytes * 1.25) + (4 << 20)))

    cost = pl.CostEstimate(
        flops=BC * Ncoil * HW,
        transcendentals=0,
        bytes_accessed=(im_r.size + 2 * sens_r.size) * itemsize,
    )

    out_r = pl.pallas_call(
        _coil_split_kernel,
        out_shape=jax.ShapeDtypeStruct((BC, Ncoil, hw_eff), sens.dtype),
        grid=grid,
        in_specs=[
            pl.BlockSpec((tbc, 1, thw), lambda i, j: (i, 0, j)),
            pl.BlockSpec((tbc, Ncoil, thw), lambda i, j: (i, 0, j)),
        ],
        out_specs=pl.BlockSpec((tbc, Ncoil, thw), lambda i, j: (i, 0, j)),
        compiler_params=pltpu.CompilerParams(
            dimension_semantics=("parallel", "parallel"),
            vmem_limit_bytes=vmem_limit,
        ),
        cost_estimate=cost,
    )(im_r, sens_r)

    if padded:
        out_r = out_r[:, :, :HW]
    return out_r.reshape(B, C, Ncoil, H, W)


if __name__ == "__main__":
    key = jax.random.PRNGKey(0)
    k_im, k_sens = jax.random.split(key)

    # Primary case: 128-aligned H*W, Ncoil a full sublane tile.
    B, C, H, W, Ncoil = 2, 4, 16, 16, 8
    im = jax.random.normal(k_im, (B, C, H, W), dtype=jnp.float32)
    sens = jax.random.normal(k_sens, (B, C, Ncoil, H, W), dtype=jnp.float32)
    out = jax.block_until_ready(coil_split(im, sens))
    ref = sens * im[:, :, None, :, :]
    assert out.shape == ref.shape
    assert jnp.allclose(out, ref, atol=1e-6, rtol=1e-6)

    # Secondary case: non-128-aligned H*W and Ncoil < 8 — exercises the
    # no-padding path (full-extent last block dim, masked tail stores).
    B2, C2, H2, W2, Ncoil2 = 2, 3, 10, 10, 3
    k1, k2 = jax.random.split(jax.random.PRNGKey(1))
    im2 = jax.random.normal(k1, (B2, C2, H2, W2), dtype=jnp.float32)
    sens2 = jax.random.normal(k2, (B2, C2, Ncoil2, H2, W2), dtype=jnp.float32)
    out2 = jax.block_until_ready(coil_split(im2, sens2))
    ref2 = sens2 * im2[:, :, None, :, :]
    assert out2.shape == ref2.shape
    assert jnp.allclose(out2, ref2, atol=1e-6, rtol=1e-6)

    print("KERNEL_OK")
</pallas_src>

<mosaic_0001>
module attributes {stable_mosaic.version = 11 : i64} {
  func.func @_coil_split_kernel(%arg0: i32, %arg1: i32, %arg2: memref<2x1x128xf32, #tpu.memory_space<vmem>>, %arg3: memref<2x8x128xf32, #tpu.memory_space<vmem>>, %arg4: memref<2x8x128xf32, #tpu.memory_space<vmem>>) attributes {dimension_semantics = [#tpu.dimension_semantics<parallel>, #tpu.dimension_semantics<parallel>], iteration_bounds = array<i64: 4, 2>, scalar_prefetch = 0 : i64, scratch_operands = 0 : i64, tpu.core_type = #tpu.core_type<tc>, window_params = [{transform_indices = @transform_0, window_bounds = array<i64: 2, 1, 128>}, {transform_indices = @transform_1, window_bounds = array<i64: 2, 8, 128>}, {transform_indices = @transform_2, window_bounds = array<i64: 2, 8, 128>}]} {
    %c0 = arith.constant 0 : index
    %c0_0 = arith.constant 0 : index
    %c0_1 = arith.constant 0 : index
    %0 = vector.load %arg3[%c0, %c0_0, %c0_1] : memref<2x8x128xf32, #tpu.memory_space<vmem>>, vector<2x8x128xf32>
    %c0_2 = arith.constant 0 : index
    %c0_3 = arith.constant 0 : index
    %c0_4 = arith.constant 0 : index
    %1 = vector.load %arg2[%c0_2, %c0_3, %c0_4] : memref<2x1x128xf32, #tpu.memory_space<vmem>>, vector<2x1x128xf32>
    %2 = vector.broadcast %1 : vector<2x1x128xf32> to vector<2x8x128xf32>
    %3 = arith.mulf %0, %2 : vector<2x8x128xf32>
    %c0_5 = arith.constant 0 : index
    %c0_6 = arith.constant 0 : index
    %c0_7 = arith.constant 0 : index
    %4 = vector.load %arg4[%c0_5, %c0_6, %c0_7] : memref<2x8x128xf32, #tpu.memory_space<vmem>>, vector<2x8x128xf32>
    tpu.vector_store %arg4[%c0_5, %c0_6, %c0_7], %3 {strides = array<i32>} : memref<2x8x128xf32, #tpu.memory_space<vmem>>, vector<2x8x128xf32>,
    return
  }
  func.func @transform_0(%arg0: i32, %arg1: i32) -> (i32, i32, i32) {
    %c0_i32 = arith.constant 0 : i32
    %c0_i32_0 = arith.constant 0 : i32
    return %arg0, %c0_i32, %arg1 : i32, i32, i32
  }
  func.func @transform_1(%arg0: i32, %arg1: i32) -> (i32, i32, i32) {
    %c0_i32 = arith.constant 0 : i32
    %c0_i32_0 = arith.constant 0 : i32
    return %arg0, %c0_i32, %arg1 : i32, i32, i32
  }
  func.func @transform_2(%arg0: i32, %arg1: i32) -> (i32, i32, i32) {
    %c0_i32 = arith.constant 0 : i32
    %c0_i32_0 = arith.constant 0 : i32
    return %arg0, %c0_i32, %arg1 : i32, i32, i32
  }
}

</mosaic_0001>

<bundles_post_ra>
// kernel: tpu_custom_call.1
= control target key start
LH: loop header
LB: loop body
LE: loop exit
PB: predicated region body
PF: predicated region fallthrough
CT: control target
= control target key end

     0   :  { %s879_s0 = inlined_call_operand.hbm [shape: f32[8,1,256], index: 0, kind: input, shape index: {}]   ;;  %s880_s1 = inlined_call_operand.hbm [shape: f32[8,8,256], index: 1, kind: input, shape index: {}]   ;;  %s881_s2 = inlined_call_operand.hbm [shape: f32[8,8,256], index: 2, kind: output, shape index: {}]  }
   0x1   :  { %886 = sst [smem:[#allocation15_spill]] %s879_s0 }
   0x2   :  { %7 = vsyncpa [#allocation3], 0 }
   0x3   :  { %9 = vsyncpa [#allocation3 + $0x1], 0 }
   0x4   :  { %10 = vsyncpa [#allocation6], 0 }
   0x5   :  { %12 = vsyncpa [#allocation6 + $0x1], 0 }
   0x6   :  { %13 = vsyncpa [#allocation4], 0 }
   0x7   :  { %15 = vsyncpa [#allocation4 + $0x1], 0  ;;  %s680_s9 = smov 0   ;;  %s682_s10 = smov 0  }
   0x8   :  { %s684_s11 = smov 0   ;;  %s686_s12 = smov 0  }
   0x9   :  { %s688_s13 = smov 0   ;;  %s690_s14 = smov 0  }
   0xa   :  { %s692_s15 = smov 0   ;;  %s694_s16 = smov 0  }
   0xb LB: > { %887 = sst [smem:[#allocation11_spill]] %s643_s14  ;;  %s376_s17 = sadd.s32 4294967295, %s651_s16   ;;  %s651_s16 = sphi %s694_s16, %s21_s16   ;;  %s647_s15 = sphi %s692_s15, %s901_s15   ;;  %s643_s14 = sphi %s690_s14, %s900_s14   ;;  %s639_s13 = sphi %s688_s13, %s899_s13   ;;  %s635_s12 = sphi %s686_s12, %s898_s12   ;;  %s631_s11 = sphi %s684_s11, %s904_s11   ;;  %s627_s10 = sphi %s682_s10, %s903_s10   ;;  %s623_s9 = sphi %s680_s9, %s902_s9  }
   0xc   : > { %888 = sst [smem:[#allocation12_spill]] %s647_s15  ;;  %s377_s18 = sadd.s32 4294967294, %s651_s16  }
   0xd   : > { %s30_s19 = sadd.s32 1, %s643_s14  ;;  %s33_s20 = sadd.s32 1, %s647_s15 }
   0xe   : > { %p31_p0 = scmp.ge.s32.totalorder %s30_s19, 2  ;;  %s42_s21 = sadd.s32 1, %s631_s11 }
   0xf   : > { %p49_p1 = scmp.ne.s32.totalorder %s631_s11, %s627_s10  ;;  %p50_p2 = scmp.eq.s32.totalorder %s651_s16, 0 }
  0x10   : > { %s906_s19 = smov (%p31_p0, %s30_s19), 0  ;;  %s908_s20 = smov (!%p31_p0, %s33_s20), %s647_s15 }
  0x11   : > { %889 = sst [smem:[#allocation13_spill]] %s906_s19  ;;  %s38_s22 = ssub.s32 %s643_s14, %s906_s19 }
  0x12   : > { %p733_p3 = por %p50_p2, %p49_p1  ;;  %p35_p4 = scmp.ge.s32.totalorder %s908_s20, 4 }
  0x13   : > { %p55_p5 = scmp.ne.s32.totalorder %s627_s10, %s623_s9  ;;  %p56_p6 = scmp.eq.s32.totalorder %s376_s17, 0 }
  0x14   : > { %p109_p7 = scmp.eq.s32.totalorder %s376_s17, 7  ;;  %s910_s20 = smov (%p35_p4, %s908_s20), 0 }
  0x15   : > { %891 = sst [smem:[#allocation14_spill]] %s910_s20  ;;  %p741_p8 = por %p56_p6, %p55_p5 }
  0x16   : > { %p745_p9 = por %p109_p7, %p49_p1  ;;  %s37_s26 = ssub.s32 %s647_s15, %s910_s20 }
  0x17   : > { %p115_p10 = scmp.eq.s32.totalorder %s377_s18, 7  ;;  %s39_s27 = sor.u32 %s38_s22, %s37_s26 }
  0x18   : > { %p40_p11 = scmp.eq.s32.totalorder %s39_s27, 0  ;;  %p420_p13 = scmp.lt.s32.totalorder %s651_s16, 8 }
  0x19   : > { %p751_p12 = por %p115_p10, %p55_p5  ;;  %s757_s29 = sand.u32 1, %s631_s11  }
  0x1a   : > { %s760_s30 = scalar_select %p40_p11, %s631_s11, %s42_s21  }
  0x1b   : > { %s380_s3 = sshll.u32 %s757_s29, 1  ;;  %s400_s4 = sshll.u32 %s647_s15, 2 }
  0x1c   : > { %s765_s5 = sadd.s32 %s643_s14, %s400_s4  ;;  %s139_s6 = scalar_lea.vmem [#allocation2], %s380_s3 }
  0x1d   : > { %s148_s7 = sshll.u32 %s139_s6, 4  ;;  %s383_s8 = sshll.u32 %s765_s5, 4  ;;  %s149_s7 = int_to_ptr.vmem [resolvable:$true] %s148_s7 }
  0x1e   : > { %s895_s0 = sld [smem:[#allocation15_spill]]  ;;  %p773_p0 = pnand %p420_p13, %p733_p3 }
  0x1f   : > { %s136_s21 = scalar_lea.sflag [#allocation3], %s757_s29  ;;  %s508_s27 = scalar_lea.vmem %s149_s7, 32 }
  0x20   : > { %p497_p1 = pneg %p773_p0  ;;  %p509_p2 = scmp.ne.s32.totalorder %s149_s7, %s508_s27 }
  0x21   : > { %s653_s3 = smov [#allocation2]  }
  0x22   : > { %p511_p4 = pnand %p509_p2, %p497_p1  ;;  %s513_s4 = sshll.u32 %s653_s3, 4  ;;  %s514_s4 = int_to_ptr.vmem [resolvable:$false] %s513_s4 }
  0x23   : > { %s515_s6 = scalar_lea.vmem %s514_s4, 64  ;;  %p516_p6 = scmp.lt.s32.totalorder %s149_s7, %s514_s4 }
  0x24   : > { %s147_s22 = scalar_lea.hbm %s895_s0, %s383_s8  ;;  %p512_p5 = pneg %p511_p4 }
  0x25   : > { %p517_p3 = scmp.lt.s32.totalorder %s515_s6, %s508_s27 }
  0x27   : > { %p518_p7 = por %p517_p3, %p516_p6 }
  0x29   : > { %p519_p10 = pnand %p518_p7, %p512_p5 }
  0x2b   : > { %522 = shalt.err (!%p519_p10)
}
  0x2c   : > { %s654_s23 = smov 32   ;;  %s655_s8 = smov 16  }
  0x2d   : > { %s656_s17 = smov 1   ;;  %p388_p11 = scmp.ge.s32.totalorder %s651_s16, 1 }
  0x2e   : > { %412 = dma.hbm_to_vmem [thread:$0]  (!%p773_p0), %s147_s22, 32, %s149_s7, %s136_s21, %s654_s23, %s655_s8, %s656_s17  }
  0x2f   : > { %p179_p13 = scmp.lt.s32.totalorder %s651_s16, 9  ;;  %s384_s18 = sshll.u32 %s757_s29, 4 }
  0x30   : > { %s387_s3 = sshll.u32 %s765_s5, 7  ;;  %s162_s4 = scalar_lea.vmem [#allocation5], %s384_s18 }
  0x31   : > { %p788_p2 = pnand %p388_p11, %p179_p13  ;;  %s171_s6 = sshll.u32 %s162_s4, 4  ;;  %s172_s6 = int_to_ptr.vmem [resolvable:$true] %s171_s6 }
  0x32   : > { %s170_s19 = scalar_lea.hbm %s880_s1, %s387_s3  ;;  %s159_s15 = scalar_lea.sflag [#allocation6], %s757_s29 }
  0x33   : > { %s536_s14 = scalar_lea.vmem %s172_s6, 256  ;;  %s657_s7 = smov [#allocation5]  }
  0x34   : > { %p537_p4 = scmp.ne.s32.totalorder %s172_s6, %s536_s14  ;;  %s541_s22 = sshll.u32 %s657_s7, 4  ;;  %s542_s22 = int_to_ptr.vmem [resolvable:$false] %s541_s22 }
  0x35   : > { %s543_s21 = scalar_lea.vmem %s542_s22, 512  ;;  %p544_p3 = scmp.lt.s32.totalorder %s172_s6, %s542_s22 }
  0x36   : > { %p539_p5 = pnand %p537_p4, %p497_p1  ;;  %p545_p7 = scmp.lt.s32.totalorder %s543_s21, %s536_s14 }
  0x38   : > { %p540_p6 = pneg %p539_p5  ;;  %p546_p10 = por %p545_p7, %p544_p3 }
  0x3a   : > { %p547_p11 = pnand %p546_p10, %p540_p6 }
  0x3c   : > { %550 = shalt.err (!%p547_p11)
}
  0x3d   : > { %s658_s5 = smov 256   ;;  %s659_s0 = smov 128  }
  0x3e   : > { %s660_s20 = smov 8   ;;  %183 = sbr.rel (%p788_p2) target bundleno = 98 (0x62), region = 28 }
  0x3f   : > { %415 = dma.hbm_to_vmem [thread:$0]  (!%p773_p0), %s170_s19, 256, %s172_s6, %s159_s15, %s658_s5, %s659_s0, %s660_s20  }
  0x40   : > { %s805_s29 = sand.u32 (!%p788_p2), 1, %s627_s10  }
  0x41   : > { %s389_s23 = sshll.u32 (!%p788_p2), %s805_s29, 1  ;;  %s186_s14 = scalar_lea.sflag (!%p788_p2), [#allocation3], %s805_s29 }
  0x42   : > { %s189_s8 = scalar_lea.vmem (!%p788_p2), [#allocation2], %s389_s23 }
  0x43   : > { %610 = dma.done.wait (%p741_p8), %s186_s14, 32  }
  0x44   : > { %612 = vsyncadd (%p741_p8), %s186_s14, 4294967264  ;;  %s390_s15 = sshll.u32 %s805_s29, 4  ;;  %s195_s19 = scalar_lea.sflag [#allocation6], %s805_s29 }
  0x45   : > { %s198_s26 = scalar_lea.vmem [#allocation5], %s390_s15 }
  0x46   : > { %614 = dma.done.wait (%p741_p8), %s195_s19, 256  }
  0x47   : > { %616 = vsyncadd (%p741_p8), %s195_s19, 4294967040  ;;  %s402_s17 = sshll.u32 %s639_s13, 2  ;;  %s223_s27 = scalar_lea.vmem [#allocation7], %s390_s15  ;;  %v227_v0 = vld [vmem:[%s198_s26] sm:$0xff]  ;;  %v392_v1 = vld [vmem:[%s189_s8] ss:$0 sm:$0xff] }
  0x48   : > { %s260_s18 = sadd.s32 %s635_s12, %s402_s17  ;;  %s263_s3 = sshll.u32 %s223_s27, 4  ;;  %v228_v2 = vld [vmem:[%s198_s26 + $0x8] sm:$0xff]  ;;  %v243_v3 = vmul.f32 %v392_v1, %v227_v0  ;;  %s821_s3 = int_to_ptr.vmem [resolvable:$true] %s263_s3 }
  0x49   : > { %s397_s4 = sshll.u32 %s260_s18, 7  ;;  %v393_v4 = vld [vmem:[%s189_s8 + $0x1] ss:$0 sm:$0xff]  ;;  %s248_s12 = scalar_lea.sflag [#allocation4], %s805_s29 }
  0x4a   : > { %s826_s7 = scalar_lea.hbm %s881_s2, %s397_s4  ;;  %v244_v5 = vmul.f32 %v393_v4, %v228_v2  ;;  %245 = vst [vmem:[%s223_s27] sm:$0xff] %v243_v3  ;;  %s551_s13 = scalar_lea.vmem %s821_s3, 256 }
  0x4b   : > { %p552_p8 = scmp.ne.s32.totalorder %s821_s3, %s551_s13  ;;  %s661_s22 = smov [#allocation7]  }
  0x4c   : > { %246 = vst [vmem:[%s223_s27 + $0x8] sm:$0xff] %v244_v5  ;;  %s555_s21 = sshll.u32 %s661_s22, 4  ;;  %s556_s21 = int_to_ptr.vmem [resolvable:$false] %s555_s21 }
  0x4d   : > { %p553_p0 = pnand %p552_p8, %p745_p9  ;;  %s557_s5 = scalar_lea.vmem %s556_s21, 512 }
  0x4e   : > { %p558_p13 = scmp.lt.s32.totalorder %s821_s3, %s556_s21  ;;  %p559_p2 = scmp.lt.s32.totalorder %s557_s5, %s551_s13 }
  0x4f   : > { %p554_p1 = pneg %p553_p0 }
  0x50   : > { %p560_p4 = por %p559_p2, %p558_p13 }
  0x52   : > { %p561_p5 = pnand %p560_p4, %p554_p1 }
  0x54   : > { %564 = shalt.err (!%p561_p5)
}
  0x55   : > { %s565_s0 = scalar_lea.hbm %s826_s7, 256  ;;  %s569_s14 = scalar_lea.hbm %s881_s2, 2048 }
  0x56   : > { %p566_p6 = scmp.ne.s32.totalorder %s826_s7, %s565_s0  ;;  %p570_p10 = scmp.lt.s32.totalorder %s826_s7, %s881_s2 }
  0x57   : > { %p571_p11 = scmp.lt.s32.totalorder %s569_s14, %s565_s0 }
  0x58   : > { %p567_p3 = pnand %p566_p6, %p745_p9 }
  0x59   : > { %p572_p8 = por %p571_p11, %p570_p10 }
  0x5a   : > { %p568_p7 = pneg %p567_p3 }
  0x5c   : > { %p573_p0 = pnand %p572_p8, %p568_p7 }
  0x5e   : > { %576 = shalt.err (!%p573_p0)
}
  0x5f   : > { %s662_s19 = smov 128   ;;  %s663_s26 = smov 256  }
  0x60   : > { %s664_s17 = smov 8  }
  0x61   : > { %407 = dma.vmem_to_hbm [thread:$0]  (%p745_p9), %s821_s3, 256, %s826_s7, %s248_s12, %s662_s19, %s663_s26, %s664_s17  }
  0x62 PF: > { %p421_p1 = scmp.ge.s32.totalorder %s651_s16, 2  ;;  %s278_s18 = sand.u32 1, %s623_s9  }
  0x63   : > { %s279_s27 = scalar_lea.sflag [#allocation4], %s278_s18 }
  0x64   : > { %p417_p13 = pnand %p421_p1, %p751_p12 }
  0x66   : > { %p418_p2 = pneg %p417_p13 }
  0x68   : > { %618 = dma.done.wait (%p418_p2), %s279_s27, 256  }
  0x69   : > { %620 = vsyncadd (%p418_p2), %s279_s27, 4294967040  ;;  %s21_s16 = sadd.s32 1, %s651_s16   ;;  %s898_s12 = sld [smem:[#allocation11_spill]] }
  0x6a   : > { %p18_p4 = scmp.ge.s32.totalorder %s21_s16, 10   ;;  %s899_s13 = sld [smem:[#allocation12_spill]] }
  0x6b   : > { %s900_s14 = sld [smem:[#allocation13_spill]]  ;;  %s902_s9 = smov %s627_s10 }
  0x6c   : > { %s901_s15 = sld [smem:[#allocation14_spill]]  ;;  %s903_s10 = smov %s631_s11 }
  0x6d   : > { %s904_s11 = smov %s760_s30  ;;  %20 = sbr.rel (!%p18_p4) target bundleno = 11 (0xb), region = 86 }
  0x72   :  { %284 = vsyncpa [#allocation3], 1 }
  0x73   :  { %286 = vsyncpa [#allocation3 + $0x1], 1 }
  0x74   :  { %287 = vsyncpa [#allocation6], 1 }
  0x75   :  { %289 = vsyncpa [#allocation6 + $0x1], 1 }
  0x76   :  { %290 = vsyncpa [#allocation4], 1 }
  0x77   :  { %292 = vsyncpa [#allocation4 + $0x1], 1 }

</bundles_post_ra>
